<compile_context>
chip_gen: v7x
topology: tpu7x:2x2x1
jax: 0.10.0
libtpu: 0.0.40
codegen_flags: <defaults>
</compile_context>

<pallas_src>
import jax
import jax.numpy as jnp
import numpy as np
from jax.experimental import pallas as pl
from jax.experimental.pallas import tpu as pltpu


def _round_up(x, m):
    return ((x + m - 1) // m) * m


# ----------------------------------------------------------------------------
# Pallas kernel
# ----------------------------------------------------------------------------
def _ds_conv_kernel(taps_ref, w_ref, b_ref, a_ref, o_ref):
    """Stride-2 3x3 conv tile as ONE matmul over K = 9*Cin, + folded-BN bias
    and PReLU epilogue.

    Block shapes:
      taps_ref : (1, tm, K)   bf16   K = 9*Cin, tap-major channel layout
      w_ref    : (K, tn)      bf16   BN scale already folded in
      b_ref    : (1, tn)      f32    folded BN bias
      a_ref    : (1, tn)      f32    PReLU slope (broadcast per channel)
      o_ref    : (1, tm, tn)  f32
    """
    y = jnp.dot(taps_ref[0], w_ref[...], preferred_element_type=jnp.float32)
    y = y + b_ref[...]                          # (tm, tn) + (1, tn)
    y = jnp.where(y > 0.0, y, a_ref[...] * y)   # PReLU
    o_ref[0] = y.astype(o_ref.dtype)


# ----------------------------------------------------------------------------
# Wrapper
# ----------------------------------------------------------------------------
def downsample_forward(params, x_nchw):
    """DownSample forward.  x_nchw: (B, C, H, W) f32 -> (B, C, Ho, Wo) f32."""
    w_flat = params["w_flat"]    # (9*C, N_pad) bf16, BN scale folded
    bias = params["bias"]        # (1, N_pad) f32
    alpha = params["alpha"]      # (1, N_pad) f32

    B, C, H, W = x_nchw.shape
    K = 9 * C
    N_pad = w_flat.shape[1]
    Ho = (H - 1) // 2 + 1
    Wo = (W - 1) // 2 + 1
    M = Ho * Wo

    # NCHW -> NHWC (channels on the 128-lane axis); bf16 BEFORE pad/slice so
    # all wrapper-side HBM traffic runs at half width.
    x = jnp.transpose(x_nchw, (0, 2, 3, 1)).astype(jnp.bfloat16)
    xpad = jnp.pad(x, ((0, 0), (1, 1), (1, 1), (0, 0)), mode="reflect")

    # Stride-2 im2col folded into the contraction dim: (B, M, 9*C), tap-major
    # channel order matching the weight rows ((dy*3+dx)*Cin + cin).
    taps = jnp.concatenate(
        [xpad[:, dy:dy + 2 * Ho:2, dx:dx + 2 * Wo:2, :].reshape(B, M, C)
         for dy in range(3) for dx in range(3)],
        axis=-1)                                             # (B, M, K) bf16

    # ---- tile selection -----------------------------------------------------
    # Lane-dense Cout tile; single block (resident weights) when it fits.
    if N_pad <= 512:
        tn = N_pad
    elif N_pad % 256 == 0:
        tn = 256
    else:
        tn = 128
    # f32 result tile <= ~192 KB (well under the 64x4KB vreg file).
    tm = min(256, (192 * 1024 // (tn * 4)) // 8 * 8)
    tm = max(8, min(tm, _round_up(M, 8)))
    # Keep the double-buffered working set within ~36 MiB (v7x: 64 MiB / TC).
    while tm > 8 and 2 * (tm * K * 2 + K * tn * 2 + tm * tn * 4) > (36 << 20):
        tm = max(8, (tm // 2) // 8 * 8)

    M_pad = _round_up(M, tm)
    if M_pad != M:
        taps = jnp.pad(taps, ((0, 0), (0, M_pad - M), (0, 0)))

    grid = (B, M_pad // tm, N_pad // tn)   # Cout innermost ("arbitrary")

    out = pl.pallas_call(
        _ds_conv_kernel,
        out_shape=jax.ShapeDtypeStruct((B, M_pad, N_pad), jnp.float32),
        grid=grid,
        in_specs=[
            pl.BlockSpec((1, tm, K), lambda b, m, n: (b, m, 0)),
            pl.BlockSpec((K, tn), lambda b, m, n: (0, n)),
            pl.BlockSpec((1, tn), lambda b, m, n: (0, n)),
            pl.BlockSpec((1, tn), lambda b, m, n: (0, n)),
        ],
        out_specs=pl.BlockSpec((1, tm, tn), lambda b, m, n: (b, m, n)),
        compiler_params=pltpu.CompilerParams(
            dimension_semantics=("parallel", "parallel", "arbitrary"),
            vmem_limit_bytes=40 << 20),
    )(taps, w_flat, bias, alpha)

    out = out[:, :M, :C].reshape(B, Ho, Wo, C)
    return jnp.transpose(out, (0, 3, 1, 2))   # back to NCHW


# ----------------------------------------------------------------------------
# Parameter init (mirrors the nn.Module defaults) + fp32 reference
# ----------------------------------------------------------------------------
def init_downsample_params(key, channels, eps=1e-5):
    # Conv2d default init: kaiming_uniform(a=sqrt(5)) -> U(-1/sqrt(fan_in), +).
    fan_in = channels * 9
    bound = 1.0 / np.sqrt(fan_in)
    w = jax.random.uniform(key, (channels, channels, 3, 3), jnp.float32,
                           -bound, bound)

    # Freshly-initialized BatchNorm2d (eval mode) and PReLU defaults.
    gamma = jnp.ones((channels,), jnp.float32)
    beta = jnp.zeros((channels,), jnp.float32)
    running_mean = jnp.zeros((channels,), jnp.float32)
    running_var = jnp.ones((channels,), jnp.float32)
    prelu_alpha = jnp.float32(0.25)

    scale = gamma / jnp.sqrt(running_var + eps)                      # (C,)
    # (Cout,Cin,kh,kw) -> (kh,kw,Cin,Cout) -> (9*Cin, Cout); fold BN scale.
    w_flat = (jnp.transpose(w, (2, 3, 1, 0)).reshape(9 * channels, channels)
              * scale[None, :])
    bias = (beta - running_mean * scale)[None, :]                    # (1, C)
    alpha = jnp.full((1, channels), prelu_alpha, jnp.float32)

    # Pad the Cout / lane axis to a multiple of 128 once, at init time, so
    # every kernel store is an unmasked full-width vst.
    n_pad = _round_up(channels, 128)
    pad_n = n_pad - channels
    w_flat = jnp.pad(w_flat, ((0, 0), (0, pad_n)))
    bias = jnp.pad(bias, ((0, 0), (0, pad_n)))
    alpha = jnp.pad(alpha, ((0, 0), (0, pad_n)))

    return {
        "w_flat": w_flat.astype(jnp.bfloat16),   # (9*C, N_pad) bf16
        "bias": bias, "alpha": alpha,            # (1, N_pad) f32
        # unfolded fp32 pieces for the reference check
        "w": w, "scale": scale, "beta": beta,
        "running_mean": running_mean, "prelu_alpha": prelu_alpha,
    }


def downsample_reference(params, x_nchw):
    """Pure-JAX fp32 reference (reflect pad -> stride-2 conv -> BN -> PReLU)."""
    xpad = jnp.pad(x_nchw, ((0, 0), (0, 0), (1, 1), (1, 1)), mode="reflect")
    y = jax.lax.conv_general_dilated(
        xpad, params["w"], window_strides=(2, 2), padding="VALID",
        dimension_numbers=("NCHW", "OIHW", "NCHW"))
    scale = params["scale"][None, :, None, None]
    bias = (params["beta"] - params["running_mean"] * params["scale"]
            )[None, :, None, None]
    y = y * scale + bias
    return jnp.where(y > 0, y, params["prelu_alpha"] * y)


# ----------------------------------------------------------------------------
if __name__ == "__main__":
    key = jax.random.PRNGKey(0)
    pkey, xkey = jax.random.split(key)

    B, C, H, W = 2, 64, 16, 16          # DownSample(channels=64)
    params = init_downsample_params(pkey, C)
    x = jax.random.normal(xkey, (B, C, H, W), jnp.float32)

    fwd = jax.jit(downsample_forward)
    out = jax.block_until_ready(fwd(params, x))

    assert out.shape == (B, C, H // 2, W // 2), out.shape
    assert out.dtype == jnp.float32

    ref = jax.block_until_ready(jax.jit(downsample_reference)(params, x))
    max_err = float(jnp.max(jnp.abs(out - ref)))
    assert max_err < 5e-2, f"max abs err vs fp32 reference: {max_err}"

    print("KERNEL_OK")
</pallas_src>

<mosaic_0001>
module attributes {stable_mosaic.version = 11 : i64} {
  func.func @_ds_conv_kernel(%arg0: i32, %arg1: i32, %arg2: i32, %arg3: memref<1x64x576xbf16, #tpu.memory_space<vmem>>, %arg4: memref<576x128xbf16, #tpu.memory_space<vmem>>, %arg5: memref<1x128xf32, #tpu.memory_space<vmem>>, %arg6: memref<1x128xf32, #tpu.memory_space<vmem>>, %arg7: memref<1x64x128xf32, #tpu.memory_space<vmem>>) attributes {dimension_semantics = [#tpu.dimension_semantics<parallel>, #tpu.dimension_semantics<parallel>, #tpu.dimension_semantics<arbitrary>], iteration_bounds = array<i64: 2, 1, 1>, scalar_prefetch = 0 : i64, scratch_operands = 0 : i64, tpu.core_type = #tpu.core_type<tc>, window_params = [{transform_indices = @transform_0, window_bounds = array<i64: 1, 64, 576>}, {transform_indices = @transform_1, window_bounds = array<i64: 576, 128>}, {transform_indices = @transform_2, window_bounds = array<i64: 1, 128>}, {transform_indices = @transform_3, window_bounds = array<i64: 1, 128>}, {transform_indices = @transform_4, window_bounds = array<i64: 1, 64, 128>}]} {
    %c0 = arith.constant 0 : index
    %c0_0 = arith.constant 0 : index
    %c0_1 = arith.constant 0 : index
    %0 = vector.load %arg3[%c0, %c0_0, %c0_1] : memref<1x64x576xbf16, #tpu.memory_space<vmem>>, vector<1x64x576xbf16>
    %1 = vector.shape_cast %0 : vector<1x64x576xbf16> to vector<64x576xbf16>
    %c0_2 = arith.constant 0 : index
    %c0_3 = arith.constant 0 : index
    %2 = vector.load %arg4[%c0_2, %c0_3] : memref<576x128xbf16, #tpu.memory_space<vmem>>, vector<576x128xbf16>
    %cst = arith.constant dense<0.000000e+00> : vector<64x128xf32>
    %3 = tpu.matmul %1, %2, %cst {dimension_numbers = #tpu.dot_dimension_numbers<[1], [0], [0], [1], [0, 0, 1, 1], [], []>} : vector<64x576xbf16>, vector<576x128xbf16>, vector<64x128xf32> -> vector<64x128xf32>
    %c0_4 = arith.constant 0 : index
    %c0_5 = arith.constant 0 : index
    %4 = vector.load %arg5[%c0_4, %c0_5] : memref<1x128xf32, #tpu.memory_space<vmem>>, vector<1x128xf32>
    %5 = vector.broadcast %4 : vector<1x128xf32> to vector<64x128xf32>
    %6 = arith.addf %3, %5 : vector<64x128xf32>
    %cst_6 = arith.constant 0.000000e+00 : f32
    %7 = vector.broadcast %cst_6 : f32 to vector<64x128xf32>
    %8 = arith.cmpf ogt, %6, %7 : vector<64x128xf32>
    %c0_7 = arith.constant 0 : index
    %c0_8 = arith.constant 0 : index
    %9 = vector.load %arg6[%c0_7, %c0_8] : memref<1x128xf32, #tpu.memory_space<vmem>>, vector<1x128xf32>
    %10 = vector.broadcast %9 : vector<1x128xf32> to vector<64x128xf32>
    %11 = arith.mulf %10, %6 : vector<64x128xf32>
    %12 = arith.select %8, %6, %11 : vector<64x128xi1>, vector<64x128xf32>
    %c0_9 = arith.constant 0 : index
    %c0_10 = arith.constant 0 : index
    %c0_11 = arith.constant 0 : index
    %13 = vector.load %arg7[%c0_9, %c0_10, %c0_11] : memref<1x64x128xf32, #tpu.memory_space<vmem>>, vector<1x64x128xf32>
    %14 = vector.shape_cast %13 : vector<1x64x128xf32> to vector<64x128xf32>
    %15 = vector.shape_cast %12 : vector<64x128xf32> to vector<1x64x128xf32>
    tpu.vector_store %arg7[%c0_9, %c0_10, %c0_11], %15 {strides = array<i32>} : memref<1x64x128xf32, #tpu.memory_space<vmem>>, vector<1x64x128xf32>,
    return
  }
  func.func @transform_0(%arg0: i32, %arg1: i32, %arg2: i32) -> (i32, i32, i32) {
    %c0_i32 = arith.constant 0 : i32
    %c0_i32_0 = arith.constant 0 : i32
    return %arg0, %arg1, %c0_i32 : i32, i32, i32
  }
  func.func @transform_1(%arg0: i32, %arg1: i32, %arg2: i32) -> (i32, i32) {
    %c0_i32 = arith.constant 0 : i32
    %c0_i32_0 = arith.constant 0 : i32
    return %c0_i32, %arg2 : i32, i32
  }
  func.func @transform_2(%arg0: i32, %arg1: i32, %arg2: i32) -> (i32, i32) {
    %c0_i32 = arith.constant 0 : i32
    %c0_i32_0 = arith.constant 0 : i32
    return %c0_i32, %arg2 : i32, i32
  }
  func.func @transform_3(%arg0: i32, %arg1: i32, %arg2: i32) -> (i32, i32) {
    %c0_i32 = arith.constant 0 : i32
    %c0_i32_0 = arith.constant 0 : i32
    return %c0_i32, %arg2 : i32, i32
  }
  func.func @transform_4(%arg0: i32, %arg1: i32, %arg2: i32) -> (i32, i32, i32) {
    %c0_i32 = arith.constant 0 : i32
    return %arg0, %arg1, %arg2 : i32, i32, i32
  }
}

</mosaic_0001>

<bundles_post_ra>
// kernel: downsample_forward.1
= control target key start
LH: loop header
LB: loop body
LE: loop exit
PB: predicated region body
PF: predicated region fallthrough
CT: control target
= control target key end

     0   :  { %s1435_s15 = smov 0   ;;  %s1437_s16 = smov 0   ;;  %s1625_s0 = inlined_call_operand.vmem [shape: bf16[2,64,576], index: 0, kind: input, shape index: {}]   ;;  %s1626_s1 = inlined_call_operand.vmem [shape: bf16[576,128], index: 1, kind: input, shape index: {}]   ;;  %s1627_s2 = inlined_call_operand.vmem [shape: f32[1,128], index: 2, kind: input, shape index: {}]   ;;  %s1628_s3 = inlined_call_operand.vmem [shape: f32[1,128], index: 3, kind: input, shape index: {}]   ;;  %s1629_s4 = inlined_call_operand.vmem [shape: f32[2,64,128], index: 4, kind: output, shape index: {}]  }
   0x1   :  { %s1439_s17 = smov 0  }
   0x2 LB: > { %s33_s18 = sadd.s32 1, %s1404_s16  ;;  %p1116_p0 = scmp.ge.s32.totalorder %s1408_s17, 1  ;;  %s1408_s17 = sphi %s1439_s17, %s14_s17   ;;  %s1404_s16 = sphi %s1437_s16, %s1631_s16   ;;  %s1400_s15 = sphi %s1435_s15, %s1630_s15  }
   0x3   : > { %p35_p1 = scmp.ge.s32.totalorder %s33_s18, 2  ;;  %p218_p2 = scmp.lt.s32.totalorder %s1408_s17, 3 }
   0x5   : > { %s1633_s18 = smov (%p35_p1, %s33_s18), 0  ;;  %p219_p3 = pnand %p1116_p0, %p218_p2 }
   0x6   : > { %v1322_v0 = vld [vmem:[%s1626_s1 + $0x40] sm:$0xff] (!%p219_p3)   ;;  %v1326_v4 = vld [vmem:[%s1626_s1 + $0x48] sm:$0xff] (!%p219_p3)   ;;  %v1330_v8 = vld [vmem:[%s1626_s1 + $0x50] sm:$0xff] (!%p219_p3)   ;;  %p267_p4 = scmp.lt.s32.totalorder (!%p219_p3), %s1400_s15, 1  ;;  %vm720_vm0 = vcmask (!%p219_p3), 523264  }
   0x7   : > { %222 = sbr.rel (%p219_p3) target bundleno = 296 (0x128), region = 36  ;;  %v1323_v1 = vld [vmem:[%s1626_s1 + $0xc0] sm:$0xff] (!%p219_p3)   ;;  %1185 = vmatprep.subr.bf16.mxu0 (!%p219_p3), %v1322_v0  ;;  %v1327_v5 = vld [vmem:[%s1626_s1 + $0xc8] sm:$0xff] (!%p219_p3)   ;;  %v1331_v9 = vld [vmem:[%s1626_s1 + $0xd0] sm:$0xff] (!%p219_p3)  }
   0x8   : > { %v1324_v2 = vld [vmem:[%s1626_s1] sm:$0xff] (!%p219_p3)   ;;  %1225 = vmatprep.subr.bf16.mxu1 (!%p219_p3), %v1323_v1  ;;  %v1328_v6 = vld [vmem:[%s1626_s1 + $0x8] sm:$0xff] (!%p219_p3)   ;;  %v1332_v10 = vld [vmem:[%s1626_s1 + $0x10] sm:$0xff] (!%p219_p3)  }
   0x9   : > { %v1325_v3 = vld [vmem:[%s1626_s1 + $0x80] sm:$0xff] (!%p219_p3)   ;;  %1186 = vmatpush3.bf16.msra.mxu0 (!%p219_p3), %v1324_v2  ;;  %v1329_v7 = vld [vmem:[%s1626_s1 + $0x88] sm:$0xff] (!%p219_p3)   ;;  %v1333_v11 = vld [vmem:[%s1626_s1 + $0x90] sm:$0xff] (!%p219_p3)  }
   0xa   : > { %1226 = vmatpush3.bf16.msra.mxu1 (!%p219_p3), %v1325_v3  ;;  %1187 = vmatprep.subr.bf16.mxu0 (!%p219_p3), %v1326_v4  ;;  %v1334_v12 = vld [vmem:[%s1626_s1 + $0x58] sm:$0xff] (!%p219_p3)   ;;  %v1338_v16 = vld [vmem:[%s1626_s1 + $0x60] sm:$0xff] (!%p219_p3)   ;;  %v1342_v20 = vld [vmem:[%s1626_s1 + $0x68] sm:$0xff] (!%p219_p3)  }
   0xb   : > { %1227 = vmatprep.subr.bf16.mxu1 (!%p219_p3), %v1327_v5  ;;  %v1335_v13 = vld [vmem:[%s1626_s1 + $0xd8] sm:$0xff] (!%p219_p3)   ;;  %v1339_v17 = vld [vmem:[%s1626_s1 + $0xe0] sm:$0xff] (!%p219_p3)   ;;  %v1343_v21 = vld [vmem:[%s1626_s1 + $0xe8] sm:$0xff] (!%p219_p3)  }
   0xc   : > { %v1336_v14 = vld [vmem:[%s1626_s1 + $0x18] sm:$0xff] (!%p219_p3)   ;;  %v1340_v18 = vld [vmem:[%s1626_s1 + $0x20] sm:$0xff] (!%p219_p3)   ;;  %v1344_v22 = vld [vmem:[%s1626_s1 + $0x28] sm:$0xff] (!%p219_p3)  }
   0xd   : > { %1188 = vmatpush3.bf16.msra.mxu0 (!%p219_p3), %v1328_v6  ;;  %v1337_v15 = vld [vmem:[%s1626_s1 + $0x98] sm:$0xff] (!%p219_p3)   ;;  %v1341_v19 = vld [vmem:[%s1626_s1 + $0xa0] sm:$0xff] (!%p219_p3)   ;;  %v1345_v23 = vld [vmem:[%s1626_s1 + $0xa8] sm:$0xff] (!%p219_p3)  }
   0xe   : > { %1228 = vmatpush3.bf16.msra.mxu1 %v1329_v7  ;;  %1189 = vmatprep.subr.bf16.mxu0 %v1330_v8  ;;  %s1635_s15 = smov (!%p267_p4, %s1400_s15), 1  ;;  %v1346_v24 = vld [vmem:[%s1626_s1 + $0x70] sm:$0xff]   ;;  %v1350_v28 = vld [vmem:[%s1626_s1 + $0x78] sm:$0xff]   ;;  %v1360_v36 = vld [vmem:[%s1626_s1 + $0x100] sm:$0xff]  }
   0xf   : > { %1229 = vmatprep.subr.bf16.mxu1 %v1331_v9  ;;  %v1347_v25 = vld [vmem:[%s1626_s1 + $0xf0] sm:$0xff]   ;;  %s1297_s27 = smul.u32 160, %s1635_s15  ;;  %v1351_v29 = vld [vmem:[%s1626_s1 + $0xf8] sm:$0xff]   ;;  %v1367_v39 = vld [vmem:[%s1626_s1 + $0x108] sm:$0xff]   ;;  %s1184_s5 = sshll.u32 %s1635_s15, 6 }
  0x10   : > { %v1348_v26 = vld [vmem:[%s1626_s1 + $0x30] sm:$0xff]   ;;  %v1352_v30 = vld [vmem:[%s1626_s1 + $0x38] sm:$0xff]   ;;  %v1120_v58 = vld [vmem:[%s1627_s2] ss:$0 sm:$0xff]  ;;  %s1605_s10 = scalar_lea.vmem %s1629_s4, %s1184_s5 }
  0x11   : > { %1190 = vmatpush3.bf16.msra.mxu0 %v1332_v10  ;;  %v1349_v27 = vld [vmem:[%s1626_s1 + $0xb0] sm:$0xff]   ;;  %s1553_s12 = scalar_lea.vmem %s1625_s0, %s1297_s27  ;;  %v1353_v31 = vld [vmem:[%s1626_s1 + $0xb8] sm:$0xff]  }
  0x12   : > { %1230 = vmatpush3.bf16.msra.mxu1 %v1333_v11  ;;  %1191 = vmatprep.subr.bf16.mxu0 %v1334_v12  ;;  %v1354_v32 = vld [vmem:[%s1553_s12] ss:$20 sps:$4 sm:$0xff]   ;;  %v1356_v33 = vld [vmem:[%s1553_s12 + $0x4] ss:$20 sps:$4 sm:$0xff]   ;;  %v1357_v34 = vld [vmem:[%s1553_s12 + $0x8] ss:$20 sps:$4 sm:$0xff]  }
  0x13   : > { %1231 = vmatprep.subr.bf16.mxu1 %v1335_v13  ;;  %v1359_v35 = vld [vmem:[%s1553_s12 + $0xc] ss:$20 sps:$4 sm:$0xff]   ;;  %765 = vmatprep.mubr.bf16.mxu0 %v1356_v33  ;;  %v1363_v38 = vld [vmem:[%s1553_s12 + $0x34] ss:$20 sps:$4 sm:$0xff]   ;;  %v1366_v41 = vld [vmem:[%s1553_s12 + $0x30] ss:$20 sps:$4 sm:$0xff]  }
  0x14   : > { %830 = vmatprep.mubr.bf16.mxu1 %v1359_v35  ;;  %v1361_v37 = vld [vmem:[%s1553_s12 + $0x2c] ss:$20 sps:$4 sm:$0xff]   ;;  %v1365_v40 = vld [vmem:[%s1553_s12 + $0x28] ss:$20 sps:$4 sm:$0xff]   ;;  %v1374_v44 = vld [vmem:[%s1626_s1 + $0x110] sm:$0xff]  }
  0x15   : > { %1192 = vmatpush3.bf16.msra.mxu0 %v1336_v14  ;;  %v1368_v42 = vld [vmem:[%s1553_s12 + $0x54] ss:$20 sps:$4 sm:$0xff]   ;;  %v1370_v43 = vld [vmem:[%s1553_s12 + $0x5c] ss:$20 sps:$4 sm:$0xff]   ;;  %v1373_v47 = vld [vmem:[%s1553_s12 + $0x58] ss:$20 sps:$4 sm:$0xff]  }
  0x16   : > { %1232 = vmatpush3.bf16.msra.mxu1 %v1337_v15  ;;  %1193 = vmatprep.subr.bf16.mxu0 %v1338_v16  ;;  %v1381_v45 = vld [vmem:[%s1626_s1 + $0x118] sm:$0xff]   ;;  %v1372_v46 = vld [vmem:[%s1553_s12 + $0x50] ss:$20 sps:$4 sm:$0xff]   ;;  %v1380_v51 = vld [vmem:[%s1553_s12 + $0x80] ss:$20 sps:$4 sm:$0xff]  }
  0x17   : > { %1233 = vmatprep.subr.bf16.mxu1 %v1339_v17  ;;  %v1375_v48 = vld [vmem:[%s1553_s12 + $0x7c] ss:$20 sps:$4 sm:$0xff]   ;;  %v1377_v49 = vld [vmem:[%s1553_s12 + $0x84] ss:$20 sps:$4 sm:$0xff]   ;;  %v1383_v53 = vld [vmem:[%s1553_s12 + $0x60] ss:$20 sps:$4 sm:$0xff]  }
  0x18   : > { %v1379_v50 = vld [vmem:[%s1553_s12 + $0x78] ss:$20 sps:$4 sm:$0xff]   ;;  %v1382_v52 = vld [vmem:[%s1553_s12 + $0x10] ss:$20 sps:$4 sm:$0xff]   ;;  %v1385_v55 = vld [vmem:[%s1553_s12 + $0x88] ss:$20 sps:$4 sm:$0xff]  }
  0x19   : > { %1194 = vmatpush3.bf16.msra.mxu0 %v1340_v18  ;;  %v1384_v54 = vld [vmem:[%s1553_s12 + $0x38] ss:$20 sps:$4 sm:$0xff]  }
  0x1a   : > { %1234 = vmatpush3.bf16.msra.mxu1 %v1341_v19  ;;  %1195 = vmatprep.subr.bf16.mxu0 %v1342_v20 }
  0x1b   : > { %1235 = vmatprep.subr.bf16.mxu1 %v1343_v21 }
  0x1d   : > { %1196 = vmatpush3.bf16.msra.mxu0 %v1344_v22 }
  0x1e   : > { %1236 = vmatpush3.bf16.msra.mxu1 %v1345_v23  ;;  %1197 = vmatprep.subr.bf16.mxu0 %v1346_v24 }
  0x1f   : > { %1237 = vmatprep.subr.bf16.mxu1 %v1347_v25 }
  0x21   : > { %1198 = vmatpush3.bf16.msra.mxu0 %v1348_v26 }
  0x22   : > { %1238 = vmatpush3.bf16.msra.mxu1 %v1349_v27  ;;  %1199 = vmatprep.subr.bf16.mxu0 %v1350_v28 }
  0x23   : > { %1239 = vmatprep.subr.bf16.mxu1 %v1351_v29 }
  0x25   : > { %1200 = vmatpush3.bf16.msra.mxu0 %v1352_v30 }
  0x26   : > { %1240 = vmatpush3.bf16.msra.mxu1 %v1353_v31  ;;  %1273 = vmatprep.subr.bf16.mxu0 %v1360_v36 }
  0x27   : > { %1289 = vmatprep.subr.bf16.mxu1 %v1360_v36 }
  0x28   : > { %766 = vmatmul.mubr.bf16.vlgmr.msra.gmra.mrb[0].mxu0 %v1354_v32 }
  0x29   : > { %831 = vmatmul.mubr.bf16.vlgmr.msra.gmra.mrb[0].mxu1 %v1357_v34  ;;  %1274 = vmatpush3.bf16.msra.mxu0 %v1360_v36 }
  0x2a   : > { %1293 = vmatpush3.bf16.msra.mxu1 %v1360_v36  ;;  %773 = vmatprep.mubr.bf16.mxu0 %v1361_v37 }
  0x2b   : > { %838 = vmatprep.mubr.bf16.mxu1 %v1363_v38  ;;  %1275 = vmatprep.subr.bf16.mxu0 %v1367_v39 }
  0x2c   : > { %1290 = vmatprep.subr.bf16.mxu1 %v1367_v39 }
  0x2d   : > { %1276 = vmatpush3.bf16.msra.mxu0 %v1367_v39 }
  0x2e   : > { %1294 = vmatpush3.bf16.msra.mxu1 %v1367_v39  ;;  %1277 = vmatprep.subr.bf16.mxu0 %v1374_v44 }
  0x2f   : > { %1291 = vmatprep.subr.bf16.mxu1 %v1374_v44 }
  0x30   : > { %774 = vmatmul.mubr.bf16.gmra.mrb[4].mxu0 %v1365_v40 }
  0x31   : > { %839 = vmatmul.mubr.bf16.gmra.mrb[4].mxu1 %v1366_v41  ;;  %781 = vmatprep.mubr.bf16.mxu0 %v1368_v42 }
  0x32   : > { %846 = vmatprep.mubr.bf16.mxu1 %v1370_v43  ;;  %1278 = vmatpush3.bf16.msra.mxu0 %v1374_v44 }
  0x33   : > { %1295 = vmatpush3.bf16.msra.mxu1 %v1374_v44  ;;  %1279 = vmatprep.subr.bf16.mxu0 %v1381_v45 }
  0x34   : > { %1292 = vmatprep.subr.bf16.mxu1 %v1381_v45 }
  0x36   : > { %1280 = vmatpush3.bf16.msra.mxu0 %v1381_v45 }
  0x37   : > { %1296 = vmatpush3.bf16.msra.mxu1 %v1381_v45 }
  0x38   : > { %782 = vmatmul.mubr.bf16.gmra.mrb[8].mxu0 %v1372_v46 }
  0x39   : > { %847 = vmatmul.mubr.bf16.gmra.mrb[8].mxu1 %v1373_v47  ;;  %789 = vmatprep.mubr.bf16.mxu0 %v1375_v48 }
  0x3a   : > { %854 = vmatprep.mubr.bf16.mxu1 %v1377_v49 }
  0x40   : > { %790 = vmatmul.mubr.bf16.gmra.mrb[12].mxu0 %v1379_v50 }
  0x41   : > { %855 = vmatmul.mubr.bf16.gmra.mrb[12].mxu1 %v1380_v51  ;;  %1281 = vmatprep.mubr.msk.bf16.mxu0 %vm720_vm0, %v1382_v52 }
  0x42   : > { %1285 = vmatprep.mubr.msk.bf16.mxu1 %vm720_vm0, %v1383_v53 }
  0x48   : > { %1282 = vmatmul.mubr.msk.bf16.vlgmr.msra.gmra.mrb[16].mxu0 %vm720_vm0, %v1384_v54 }
  0x49   : > { %1286 = vmatmul.mubr.msk.bf16.vlgmr.msra.gmra.mrb[16].mxu1 %vm720_vm0, %v1385_v55 }
  0xfb   : > { %v1201_v56 = vpop.f32.mrb[0].mxu0 }
  0xfc   : > { %v1241_v57 = vpop.f32.mrb[0].mxu1  ;;  %v1202_v59 = vpop.f32.mrb[1].mxu0 }
  0xfd   : > { %v1203_v60 = vadd.f32 %v1202_v59, %v1201_v56  ;;  %v1242_v61 = vpop.f32.mrb[1].mxu1  ;;  %v1204_v62 = vpop.f32.mrb[2].mxu0 }
  0xfe   : > { %v1243_v63 = vadd.f32 %v1242_v61, %v1241_v57  ;;  %v1244_v0 = vpop.f32.mrb[2].mxu1  ;;  %v1205_v1 = vpop.f32.mrb[3].mxu0  ;;  %v1181_v57 = vld [vmem:[%s1628_s3] ss:$0 sm:$0xff] }
  0xff   : > { %v768_v2 = vadd.f32 %v1203_v60, %v1120_v58  ;;  %v1206_v3 = vadd.f32 %v1205_v1, %v1204_v62  ;;  %v1245_v4 = vpop.f32.mrb[3].mxu1 }
 0x100   : > { %v1246_v5 = vadd.f32 %v1245_v4, %v1244_v0 }
 0x101   : > { %v771_v6 = vadd.f32 %v1206_v3, %v1120_v58  ;;  %v833_v7 = vadd.f32 %v1243_v63, %v768_v2 }
 0x103   : > { %v1207_v8 = vpop.f32.mrb[4].mxu0  ;;  %v1596_v9 = vadd.f32 %v1246_v5, %v771_v6 }
 0x104   : > { %v1247_v10 = vpop.f32.mrb[4].mxu1  ;;  %v1208_v11 = vpop.f32.mrb[5].mxu0 }
 0x105   : > { %v1209_v12 = vadd.f32 %v1208_v11, %v1207_v8  ;;  %v1248_v13 = vpop.f32.mrb[5].mxu1  ;;  %v1210_v14 = vpop.f32.mrb[6].mxu0 }
 0x106   : > { %v1249_v15 = vadd.f32 %v1248_v13, %v1247_v10  ;;  %v1250_v16 = vpop.f32.mrb[6].mxu1  ;;  %v1211_v17 = vpop.f32.mrb[7].mxu0 }
 0x107   : > { %v776_v18 = vadd.f32 %v1209_v12, %v1120_v58  ;;  %v1212_v19 = vadd.f32 %v1211_v17, %v1210_v14  ;;  %v1251_v20 = vpop.f32.mrb[7].mxu1 }
 0x108   : > { %v1252_v21 = vadd.f32 %v1251_v20, %v1250_v16 }
 0x109   : > { %v779_v22 = vadd.f32 %v1212_v19, %v1120_v58  ;;  %v841_v23 = vadd.f32 %v1249_v15, %v776_v18 }
 0x10b   : > { %v1213_v24 = vpop.f32.mrb[8].mxu0  ;;  %v844_v25 = vadd.f32 %v1252_v21, %v779_v22 }
 0x10c   : > { %v1253_v26 = vpop.f32.mrb[8].mxu1  ;;  %v1214_v27 = vpop.f32.mrb[9].mxu0 }
 0x10d   : > { %v1215_v28 = vadd.f32 %v1214_v27, %v1213_v24  ;;  %v1254_v29 = vpop.f32.mrb[9].mxu1  ;;  %v1216_v30 = vpop.f32.mrb[10].mxu0 }
 0x10e   : > { %v1255_v31 = vadd.f32 %v1254_v29, %v1253_v26  ;;  %v1256_v32 = vpop.f32.mrb[10].mxu1  ;;  %v1217_v33 = vpop.f32.mrb[11].mxu0 }
 0x10f   : > { %v784_v34 = vadd.f32 %v1215_v28, %v1120_v58  ;;  %v1218_v35 = vadd.f32 %v1217_v33, %v1216_v30  ;;  %v1257_v36 = vpop.f32.mrb[11].mxu1 }
 0x110   : > { %v1258_v37 = vadd.f32 %v1257_v36, %v1256_v32 }
 0x111   : > { %v787_v38 = vadd.f32 %v1218_v35, %v1120_v58  ;;  %v849_v39 = vadd.f32 %v1255_v31, %v784_v34 }
 0x113   : > { %v1219_v40 = vpop.f32.mrb[12].mxu0  ;;  %v852_v41 = vadd.f32 %v1258_v37, %v787_v38 }
 0x114   : > { %v1259_v42 = vpop.f32.mrb[12].mxu1  ;;  %v1220_v43 = vpop.f32.mrb[13].mxu0 }
 0x115   : > { %v1221_v44 = vadd.f32 %v1220_v43, %v1219_v40  ;;  %v1260_v45 = vpop.f32.mrb[13].mxu1  ;;  %v1222_v46 = vpop.f32.mrb[14].mxu0 }
 0x116   : > { %v1261_v47 = vadd.f32 %v1260_v45, %v1259_v42  ;;  %v1262_v48 = vpop.f32.mrb[14].mxu1  ;;  %v1223_v49 = vpop.f32.mrb[15].mxu0 }
 0x117   : > { %v792_v50 = vadd.f32 %v1221_v44, %v1120_v58  ;;  %v1224_v51 = vadd.f32 %v1223_v49, %v1222_v46  ;;  %v1263_v52 = vpop.f32.mrb[15].mxu1 }
 0x118   : > { %v1264_v53 = vadd.f32 %v1263_v52, %v1262_v48 }
 0x119   : > { %v795_v54 = vadd.f32 %v1224_v51, %v1120_v58  ;;  %v857_v55 = vadd.f32 %v1261_v47, %v792_v50 }
 0x11b   : > { %v1283_v56 = vpop.f32.mrb[16].mxu0  ;;  %v860_v59 = vadd.f32 %v1264_v53, %v795_v54 }
 0x11c   : > { %v906_v60 = vadd.f32 %v1283_v56, %v841_v23  ;;  %v1287_v61 = vpop.f32.mrb[16].mxu1  ;;  %v897_v62 = vpop.f32.mrb[17].mxu0 }
 0x11d   : > { %v922_v63 = vadd.f32 %v1287_v61, %v857_v55  ;;  %v898_v0 = vadd.f32 %v897_v62, %v833_v7  ;;  %v913_v1 = vpop.f32.mrb[17].mxu1  ;;  %v1284_v2 = vpop.f32.mrb[18].mxu0 }
 0x11e   : > { %vm930_vm1 = vcmp.gt.f32.partialorder %v906_v60, 0.0  ;;  %v945_v58 = vmul.f32 %v1181_v57, %v906_v60  ;;  %v914_v3 = vadd.f32 %v913_v1, %v849_v39  ;;  %v909_v4 = vadd.f32 %v1284_v2, %v844_v25  ;;  %v1288_v5 = vpop.f32.mrb[18].mxu1  ;;  %v900_v6 = vpop.f32.mrb[19].mxu0 }
 0x11f   : > { %vm934_vm2 = vcmp.gt.f32.partialorder %v922_v63, 0.0  ;;  %v949_v8 = vmul.f32 %v1181_v57, %v922_v63  ;;  %vm928_vm3 = vcmp.gt.f32.partialorder %v898_v0, 0.0  ;;  %v943_v7 = vmul.f32 %v1181_v57, %v898_v0  ;;  %v916_v10 = vpop.f32.mrb[19].mxu1 }
 0x120   : > { %v953_v11 = vsel %vm930_vm1, %v906_v60, %v945_v58  ;;  %vm932_vm4 = vcmp.gt.f32.partialorder %v914_v3, 0.0  ;;  %v947_v12 = vmul.f32 %v1181_v57, %v914_v3  ;;  %vm931_vm5 = vcmp.gt.f32.partialorder %v909_v4, 0.0 }
 0x121   : > { %961 = vst [vmem:[%s1605_s10 + $0x10] sm:$0xff] %v953_v11  ;;  %v957_v13 = vsel %vm934_vm2, %v922_v63, %v949_v8  ;;  %v951_v14 = vsel %vm928_vm3, %v898_v0, %v943_v7  ;;  %v946_v15 = vmul.f32 %v1181_v57, %v909_v4  ;;  %v925_v16 = vadd.f32 %v1288_v5, %v860_v59 }
 0x122   : > { %965 = vst [vmem:[%s1605_s10 + $0x30] sm:$0xff] %v957_v13  ;;  %959 = vst [vmem:[%s1605_s10] sm:$0xff] %v951_v14  ;;  %v955_v17 = vsel %vm932_vm4, %v914_v3, %v947_v12  ;;  %v901_v18 = vadd.f32 %v900_v6, %v1596_v9  ;;  %v917_v19 = vadd.f32 %v916_v10, %v852_v41 }
 0x123   : > { %963 = vst [vmem:[%s1605_s10 + $0x20] sm:$0xff] %v955_v17  ;;  %v954_v20 = vsel %vm931_vm5, %v909_v4, %v946_v15  ;;  %vm935_vm6 = vcmp.gt.f32.partialorder %v925_v16, 0.0  ;;  %v950_v21 = vmul.f32 %v1181_v57, %v925_v16 }
 0x124   : > { %962 = vst [vmem:[%s1605_s10 + $0x18] sm:$0xff] %v954_v20  ;;  %vm929_vm7 = vcmp.gt.f32.partialorder %v901_v18, 0.0  ;;  %v944_v22 = vmul.f32 %v1181_v57, %v901_v18  ;;  %vm933_vm8 = vcmp.gt.f32.partialorder %v917_v19, 0.0  ;;  %v948_v23 = vmul.f32 %v1181_v57, %v917_v19 }
 0x125   : > { %v958_v24 = vsel %vm935_vm6, %v925_v16, %v950_v21 }
 0x126   : > { %966 = vst [vmem:[%s1605_s10 + $0x38] sm:$0xff] %v958_v24  ;;  %v952_v25 = vsel %vm929_vm7, %v901_v18, %v944_v22  ;;  %v956_v26 = vsel %vm933_vm8, %v917_v19, %v948_v23 }
 0x127   : > { %960 = vst [vmem:[%s1605_s10 + $0x8] sm:$0xff] %v952_v25  ;;  %964 = vst [vmem:[%s1605_s10 + $0x28] sm:$0xff] %v956_v26 }
 0x128 PF: > { %s14_s17 = sadd.s32 1, %s1408_s17   ;;  %s1630_s15 = smov %s1404_s16 }
 0x129   : > { %p11_p5 = scmp.ge.s32.totalorder %s14_s17, 4   ;;  %s1631_s16 = smov %s1633_s18 }
 0x12b   :  { %13 = sbr.rel (!%p11_p5) target bundleno = 2 (0x2), region = 75 }

</bundles_post_ra>
